<compile_context>
chip_gen: v5e
topology: v5e:2x2
jax: 0.10.0
libtpu: 0.0.40
codegen_flags: <defaults>
</compile_context>

<pallas_src>
import functools

import jax
import jax.numpy as jnp
from jax.experimental import pallas as pl
from jax.experimental.pallas import tpu as pltpu


def _groupnorm_kernel(eps, inv_nm1, x_ref, sb_ref, o_ref):
    # x_ref block: (..., CH, TW); stats are per lane column, reduced over the
    # CH (sublane) axis == axis -2.  Works for both the (BN, CH, TW) and the
    # lane-dense (CH, TW) layouts.
    x = x_ref[...]
    xf = x if x.dtype == jnp.float32 else x.astype(jnp.float32)
    mean = jnp.mean(xf, axis=-2, keepdims=True)
    diff = xf - mean
    # unbiased variance (torch.var default): divide by n - 1 == CH - 1
    var = jnp.sum(diff * diff, axis=-2, keepdims=True) * jnp.float32(inv_nm1)
    inv = jax.lax.rsqrt(var + jnp.float32(eps))
    s = sb_ref[0]          # (CH, 1) — broadcasts over lanes (and batch) for free
    b = sb_ref[1]
    o_ref[...] = (diff * inv * s + b).astype(o_ref.dtype)


def _vmem_capacity_bytes():
    """Physical VMEM of the current chip generation (fallback: 64 MiB, v7x)."""
    try:
        cap = int(pltpu.get_tpu_info().vmem_capacity_bytes)
        if cap > 0:
            return cap
    except Exception:
        pass
    return 64 * 1024 * 1024


_TW_CANDS = (2048, 1024, 512, 384, 256, 128)


def _lane_tiles(total):
    """Lane-dense tile candidates (multiples of 128 dividing `total`), largest first."""
    cands = [c for c in _TW_CANDS if c <= total and total % c == 0]
    return cands if cands else [total]


def _block_vmem_bytes(rows, ch, tw, itemsize):
    """Estimated VMEM use of one grid step for a (rows, ch, tw) block."""
    blk = rows * ch * tw
    io = 4 * blk * itemsize          # in + out blocks, double-buffered
    tmp = 3 * blk * 4                # f32 temporaries (xf / diff / y)
    sb = 2 * 2 * ch * 128 * 4        # (2, CH, 1) padded to 128 lanes, double-buffered
    return io + tmp + sb


def group_norm(x, scale, bias, *, group=4, eps=1e-5):
    """x: (N, C, H, W). scale/bias: (1, C, 1, 1). Returns (N, C, H, W)."""
    N, C, H, W = x.shape
    assert C % group == 0
    CH = C * H
    assert CH > 1, "unbiased variance (n-1) requires C*H > 1"
    itemsize = x.dtype.itemsize

    # Generation-aware VMEM budget: ~75% of physical (≈96 MiB on v5e/v6e,
    # ≈48 MiB on v7x), with extra headroom for the per-block fit check.
    vmem_cap = _vmem_capacity_bytes()
    vmem_limit = int(vmem_cap * 3 // 4)
    headroom = int(vmem_limit * 0.8)

    # Per-channel affine expanded over H (C-major-then-H to match the (C, H)->CH
    # flattening of x), folded into a single (2, CH, 1) f32 input.
    scale_ch = jnp.broadcast_to(scale.reshape(C, 1, 1), (C, H, 1)).reshape(CH, 1)
    bias_ch = jnp.broadcast_to(bias.reshape(C, 1, 1), (C, H, 1)).reshape(CH, 1)
    sb = jnp.stack([scale_ch, bias_ch], axis=0).astype(jnp.float32)  # (2, CH, 1)

    kernel = functools.partial(_groupnorm_kernel, eps, 1.0 / (CH - 1))
    cost = pl.CostEstimate(
        flops=int(8 * N * CH * W),
        transcendentals=int(N * W),
        bytes_accessed=int(2 * N * CH * W * itemsize + 2 * CH * 4),
    )

    # ---- lane-dense path for small W, large N --------------------------------
    # Stats are per (n, w) column, so presenting x as (CH, N*W) is semantically
    # identical while keeping output stores lane-dense (unmasked vst).  Only
    # worth the extra XLA transpose when W itself is lane-sparse and N*W is big.
    use_transposed = (W < 128) and (N * W >= 256)

    if use_transposed:
        NW = N * W
        xt = x.reshape(N, CH, W).transpose(1, 0, 2).reshape(CH, NW)
        tw_cands = _lane_tiles(NW)
        TW = tw_cands[-1]
        for cand in tw_cands:
            if _block_vmem_bytes(1, CH, cand, itemsize) <= headroom:
                TW = cand
                break
        # TODO(synk): if even the smallest lane tile overflows VMEM (huge C*H),
        # fall back to a CH-chunked two-pass sum/sumsq kernel.
        if NW // TW < 2:  # keep >= 2 grid programs for v7x's two TensorCores
            smaller = [c for c in tw_cands if c < TW]
            if smaller:
                TW = smaller[0]
        grid = (NW // TW,)

        out_t = pl.pallas_call(
            kernel,
            out_shape=jax.ShapeDtypeStruct((CH, NW), x.dtype),
            grid_spec=pltpu.PrefetchScalarGridSpec(
                num_scalar_prefetch=0,
                grid=grid,
                in_specs=[
                    pl.BlockSpec((CH, TW), lambda j: (0, j)),
                    pl.BlockSpec((2, CH, 1), lambda j: (0, 0, 0)),
                ],
                out_specs=pl.BlockSpec((CH, TW), lambda j: (0, j)),
            ),
            compiler_params=pltpu.CompilerParams(
                dimension_semantics=("parallel",),
                vmem_limit_bytes=vmem_limit,
            ),
            cost_estimate=cost,
        )(xt, sb)
        out = out_t.reshape(CH, N, W).transpose(1, 0, 2)
        return out.reshape(N, C, H, W)

    # ---- general path: (N, CH, W), W on lanes ---------------------------------
    x2 = x.reshape(N, CH, W)

    # Lane tile: largest lane-dense candidate (up to 2048) that fits VMEM;
    # fall back to full W for small / awkward widths.
    tw_cands = _lane_tiles(W)
    TW = tw_cands[-1]
    for cand in tw_cands:
        if _block_vmem_bytes(1, CH, cand, itemsize) <= headroom:
            TW = cand
            break
    # TODO(synk): if even the smallest lane tile overflows VMEM (huge C*H),
    # fall back to a CH-chunked two-pass sum/sumsq kernel.

    # Fold batch samples into one block to amortize per-grid-step overhead.
    # Target a few MiB of x traffic per step; never exceed the VMEM headroom.
    target_blk_bytes = 8 * 1024 * 1024
    BN = 1
    for cand in range(N, 0, -1):
        if N % cand:
            continue
        if _block_vmem_bytes(cand, CH, TW, itemsize) > headroom:
            continue
        if cand > 1 and cand * CH * TW * itemsize > target_blk_bytes:
            continue
        BN = cand
        break

    # Don't collapse the grid to a single program (idles one v7x TensorCore).
    if (N // BN) * (W // TW) < 2 and N >= 2:
        BN = max(d for d in range(1, N // 2 + 1) if N % d == 0)

    grid = (N // BN, W // TW)

    out2 = pl.pallas_call(
        kernel,
        out_shape=jax.ShapeDtypeStruct((N, CH, W), x.dtype),
        grid_spec=pltpu.PrefetchScalarGridSpec(
            num_scalar_prefetch=0,
            grid=grid,
            in_specs=[
                pl.BlockSpec((BN, CH, TW), lambda i, j: (i, 0, j)),
                pl.BlockSpec((2, CH, 1), lambda i, j: (0, 0, 0)),
            ],
            out_specs=pl.BlockSpec((BN, CH, TW), lambda i, j: (i, 0, j)),
        ),
        compiler_params=pltpu.CompilerParams(
            dimension_semantics=("parallel", "parallel"),
            vmem_limit_bytes=vmem_limit,
        ),
        cost_estimate=cost,
    )(x2, sb)

    return out2.reshape(N, C, H, W)


def _reference(x, scale, bias, *, group=4, eps=1e-5):
    # Pure-JAX mirror of the PyTorch forward, for verification.
    N, C, H, W = x.shape
    xr = x.reshape(N, group, C // group, H, W).astype(jnp.float32)
    axes = (1, 2, 3)
    mean = jnp.mean(xr, axis=axes, keepdims=True)
    n = group * (C // group) * H
    var = jnp.sum((xr - mean) ** 2, axis=axes, keepdims=True) / (n - 1)
    y = (xr - mean) / jnp.sqrt(var + eps)
    y = y.reshape(N, C, H, W)
    return y * scale + bias


if __name__ == "__main__":
    num_features = 4
    group = 4
    eps = 1e-5

    N, C, H, W = 2, num_features, 16, 16
    key = jax.random.PRNGKey(0)
    x = jax.random.normal(key, (N, C, H, W), dtype=jnp.float32)

    # Deterministic parameter init (matches nn.init.ones_ / zeros_).
    scale = jnp.ones((1, C, 1, 1), dtype=jnp.float32)
    bias = jnp.zeros((1, C, 1, 1), dtype=jnp.float32)

    out = group_norm(x, scale, bias, group=group, eps=eps)
    out = jax.block_until_ready(out)

    ref = _reference(x, scale, bias, group=group, eps=eps)
    assert out.shape == (N, C, H, W)
    assert jnp.allclose(out, ref, atol=1e-5, rtol=1e-5)

    print("KERNEL_OK")
</pallas_src>

<mosaic_0001>
module attributes {stable_mosaic.version = 11 : i64} {
  func.func @_groupnorm_kernel(%arg0: i32, %arg1: i32, %arg2: memref<1x64x16xf32, #tpu.memory_space<vmem>>, %arg3: memref<2x64x1xf32, #tpu.memory_space<vmem>>, %arg4: memref<1x64x16xf32, #tpu.memory_space<vmem>>) attributes {dimension_semantics = [#tpu.dimension_semantics<parallel>, #tpu.dimension_semantics<parallel>], iteration_bounds = array<i64: 2, 1>, scalar_prefetch = 0 : i64, scratch_operands = 0 : i64, tpu.core_type = #tpu.core_type<tc>, window_params = [{transform_indices = @transform_0, window_bounds = array<i64: 1, 64, 16>}, {pipeline_mode = #tpu.pipeline_mode<synchronous>, transform_indices = @transform_1, window_bounds = array<i64: 2, 64, 1>}, {transform_indices = @transform_2, window_bounds = array<i64: 1, 64, 16>}]} {
    %c0 = arith.constant 0 : index
    %c0_0 = arith.constant 0 : index
    %c0_1 = arith.constant 0 : index
    %0 = vector.load %arg2[%c0, %c0_0, %c0_1] : memref<1x64x16xf32, #tpu.memory_space<vmem>>, vector<1x64x16xf32>
    %cst = arith.constant dense<0.000000e+00> : vector<1x16xf32>
    %1 = vector.multi_reduction <add>, %0, %cst [1] : vector<1x64x16xf32> to vector<1x16xf32>
    %2 = vector.shape_cast %1 : vector<1x16xf32> to vector<1x1x16xf32>
    %cst_2 = arith.constant 6.400000e+01 : f32
    %3 = vector.broadcast %cst_2 : f32 to vector<1x1x16xf32>
    %4 = arith.divf %2, %3 : vector<1x1x16xf32>
    %5 = vector.broadcast %4 : vector<1x1x16xf32> to vector<1x64x16xf32>
    %6 = arith.subf %0, %5 : vector<1x64x16xf32>
    %7 = arith.mulf %6, %6 : vector<1x64x16xf32>
    %cst_3 = arith.constant dense<0.000000e+00> : vector<1x16xf32>
    %8 = vector.multi_reduction <add>, %7, %cst_3 [1] : vector<1x64x16xf32> to vector<1x16xf32>
    %9 = vector.shape_cast %8 : vector<1x16xf32> to vector<1x1x16xf32>
    %cst_4 = arith.constant 0.0158730168 : f32
    %10 = vector.broadcast %cst_4 : f32 to vector<1x1x16xf32>
    %11 = arith.mulf %9, %10 : vector<1x1x16xf32>
    %cst_5 = arith.constant 9.99999974E-6 : f32
    %12 = vector.broadcast %cst_5 : f32 to vector<1x1x16xf32>
    %13 = arith.addf %11, %12 : vector<1x1x16xf32>
    %14 = math.rsqrt %13 : vector<1x1x16xf32>
    %c0_6 = arith.constant 0 : index
    %c0_7 = arith.constant 0 : index
    %c0_8 = arith.constant 0 : index
    %15 = vector.load %arg3[%c0_6, %c0_7, %c0_8] : memref<2x64x1xf32, #tpu.memory_space<vmem>>, vector<1x64x1xf32>
    %16 = vector.shape_cast %15 : vector<1x64x1xf32> to vector<64x1xf32>
    %c1 = arith.constant 1 : index
    %c0_9 = arith.constant 0 : index
    %c0_10 = arith.constant 0 : index
    %17 = vector.load %arg3[%c1, %c0_9, %c0_10] : memref<2x64x1xf32, #tpu.memory_space<vmem>>, vector<1x64x1xf32>
    %18 = vector.shape_cast %17 : vector<1x64x1xf32> to vector<64x1xf32>
    %19 = vector.broadcast %14 : vector<1x1x16xf32> to vector<1x64x16xf32>
    %20 = arith.mulf %6, %19 : vector<1x64x16xf32>
    %21 = vector.shape_cast %16 : vector<64x1xf32> to vector<1x64x1xf32>
    %22 = vector.broadcast %21 : vector<1x64x1xf32> to vector<1x64x16xf32>
    %23 = arith.mulf %20, %22 : vector<1x64x16xf32>
    %24 = vector.shape_cast %18 : vector<64x1xf32> to vector<1x64x1xf32>
    %25 = vector.broadcast %24 : vector<1x64x1xf32> to vector<1x64x16xf32>
    %26 = arith.addf %23, %25 : vector<1x64x16xf32>
    %c0_11 = arith.constant 0 : index
    %c0_12 = arith.constant 0 : index
    %c0_13 = arith.constant 0 : index
    %27 = vector.load %arg4[%c0_11, %c0_12, %c0_13] : memref<1x64x16xf32, #tpu.memory_space<vmem>>, vector<1x64x16xf32>
    tpu.vector_store %arg4[%c0_11, %c0_12, %c0_13], %26 {strides = array<i32>} : memref<1x64x16xf32, #tpu.memory_space<vmem>>, vector<1x64x16xf32>,
    return
  }
  func.func @transform_0(%arg0: i32, %arg1: i32) -> (i32, i32, i32) {
    %c0_i32 = arith.constant 0 : i32
    %c0_i32_0 = arith.constant 0 : i32
    return %arg0, %c0_i32, %arg1 : i32, i32, i32
  }
  func.func @transform_1(%arg0: i32, %arg1: i32) -> (i32, i32, i32) {
    %c0_i32 = arith.constant 0 : i32
    %c0_i32_0 = arith.constant 0 : i32
    %c0_i32_1 = arith.constant 0 : i32
    %c0_i32_2 = arith.constant 0 : i32
    return %c0_i32, %c0_i32_0, %c0_i32_1 : i32, i32, i32
  }
  func.func @transform_2(%arg0: i32, %arg1: i32) -> (i32, i32, i32) {
    %c0_i32 = arith.constant 0 : i32
    %c0_i32_0 = arith.constant 0 : i32
    return %arg0, %c0_i32, %arg1 : i32, i32, i32
  }
}

</mosaic_0001>

<bundles_post_ra>
// kernel: tpu_custom_call.1
= control target key start
LH: loop header
LB: loop body
LE: loop exit
PB: predicated region body
PF: predicated region fallthrough
CT: control target
= control target key end

     0   :  { %s569_s9 = smov 0   ;;  %s571_s10 = smov 0   ;;  %s728_s0 = inlined_call_operand.vmem [shape: f32[2,64,16], index: 0, kind: input, shape index: {}]   ;;  %s729_s1 = inlined_call_operand.vmem [shape: f32[2,64,1], index: 1, kind: input, shape index: {}]   ;;  %s730_s2 = inlined_call_operand.vmem [shape: f32[2,64,16], index: 2, kind: output, shape index: {}]  }
   0x1   :  { %s573_s11 = smov 0  }
   0x2 LB: > { %s24_s12 = sadd.s32 1, %s546_s10  ;;  %p478_p0 = scmp.ge.s32.totalorder %s550_s11, 1  ;;  %s550_s11 = sphi %s573_s11, %s12_s11   ;;  %s546_s10 = sphi %s571_s10, %s732_s10   ;;  %s542_s9 = sphi %s569_s9, %s731_s9  }
   0x3   : > { %p26_p1 = scmp.ge.s32.totalorder %s24_s12, 2  ;;  %p131_p2 = scmp.lt.s32.totalorder %s550_s11, 3 }
   0x5   : > { %s734_s12 = smov (%p26_p1, %s24_s12), 0  ;;  %p132_p3 = pnand %p478_p0, %p131_p2 }
   0x6   : > { %p159_p4 = scmp.lt.s32.totalorder (!%p132_p3), %s542_s9, 1 }
   0x7   : > { %135 = sbr.rel (%p132_p3) target bundleno = 173 (0xad), region = 28 }
   0xc   : > { %v266_v0 = vld [vmem:[%s729_s1 + $0x20] sm:$0xff]  ;;  %v264_v1 = vld [vmem:[%s729_s1 + $0x10] sm:$0xff]  ;;  %v552_v3 = vmov 0   ;;  %s736_s9 = smov (!%p159_p4, %s542_s9), 1  ;;  %vm183_vm0 = vcmask 130048   ;;  %v267_v7 = vld [vmem:[%s729_s1 + $0x28] sm:$0xff] }
   0xd   : > { %v262_v2 = vld [vmem:[%s729_s1] sm:$0xff]  ;;  %523 = vset.pattern.permute.xlu2 %v552_v3  ;;  %522 = vset.pattern.permute.xlu1 %v552_v3  ;;  %s493_s19 = sshll.u32 %s736_s9, 6  ;;  %v265_v12 = vld [vmem:[%s729_s1 + $0x18] sm:$0xff]  ;;  %v263_v13 = vld [vmem:[%s729_s1 + $0x8] sm:$0xff]  ;;  %v553_v23 = vmov 64.0  }
   0xe   : > { %521 = vset.pattern.permute.xlu0 %v552_v3  ;;  %309 = vperm.xlu2 %523, %v266_v0   ;;  %s166_s22 = scalar_lea.vmem %s728_s0, %s493_s19  ;;  %524 = vrcp.f32 %v553_v23  ;;  %v483_v26 = vld [vmem:[%s729_s1 + $0x40] sm:$0xff]  ;;  %v269_v28 = vld [vmem:[%s729_s1 + $0x38] sm:$0xff]  ;;  %v268_v29 = vld [vmem:[%s729_s1 + $0x30] sm:$0xff]  ;;  %s696_s28 = scalar_lea.vmem %s730_s2, %s493_s19 }
   0xf   : > { %299 = vperm.xlu1 %522, %v264_v1   ;;  %289 = vperm.xlu0 %521, %v262_v2   ;;  %v604_v4 = vld [vmem:[%s166_s22] sm:$0xff]  ;;  %v606_v5 = vld [vmem:[%s166_s22 + $0x8] sm:$0xff]  ;;  %v608_v6 = vld [vmem:[%s166_s22 + $0x10] sm:$0xff] }
  0x10   : > { %v178_v8 = vld [vmem:[%s166_s22 + $0x18] sm:$0xff]  ;;  %v184_v9 = vsel %vm183_vm0, %v604_v4, 0.0  ;;  %v185_v10 = vsel %vm183_vm0, %v606_v5, 0.0  ;;  %v187_v11 = vsel %vm183_vm0, %v608_v6, 0.0  ;;  %v179_v14 = vld [vmem:[%s166_s22 + $0x20] sm:$0xff]  ;;  %v180_v17 = vld [vmem:[%s166_s22 + $0x28] sm:$0xff] }
  0x11   : > { %v186_v15 = vadd.f32 %v185_v10, %v184_v9  ;;  %v189_v16 = vsel %vm183_vm0, %v178_v8, 0.0  ;;  %v191_v19 = vsel %vm183_vm0, %v179_v14, 0.0  ;;  %v181_v20 = vld [vmem:[%s166_s22 + $0x30] sm:$0xff]  ;;  %v193_v22 = vsel %vm183_vm0, %v180_v17, 0.0  ;;  %v182_v24 = vld [vmem:[%s166_s22 + $0x38] sm:$0xff]  ;;  %v484_v40 = vld [vmem:[%s729_s1 + $0x48] sm:$0xff] }
  0x12   : > { %v195_v27 = vsel %vm183_vm0, %v181_v20, 0.0  ;;  %v197_v31 = vsel %vm183_vm0, %v182_v24, 0.0  ;;  %v486_v38 = vld [vmem:[%s729_s1 + $0x58] sm:$0xff]  ;;  %v485_v39 = vld [vmem:[%s729_s1 + $0x50] sm:$0xff]  ;;  %v488_v49 = vld [vmem:[%s729_s1 + $0x68] sm:$0xff] }
  0x13   : > { %v188_v18 = vadd.f32 %v187_v11, %v186_v15  ;;  %v489_v47 = vld [vmem:[%s729_s1 + $0x70] sm:$0xff]  ;;  %v487_v50 = vld [vmem:[%s729_s1 + $0x60] sm:$0xff]  ;;  %v490_v63 = vld [vmem:[%s729_s1 + $0x78] sm:$0xff] }
  0x14   : > { %v525_v33 = vpop.eup %524 }
  0x15   : > { %v190_v21 = vadd.f32 %v189_v16, %v188_v18  ;;  %v206_v35 = vmul.f32 64.0, %v525_v33  ;;  %vm210_vm1 = vweird.f32 %v525_v33 }
  0x16   : > { %314 = vperm.xlu2 %523, %v267_v7  }
  0x17   : > { %304 = vperm.xlu1 %522, %v265_v12   ;;  %294 = vperm.xlu0 %521, %v263_v13   ;;  %v192_v25 = vadd.f32 %v191_v19, %v190_v21  ;;  %v207_v37 = vsub.f32 1.0, %v206_v35 }
  0x19   : > { %v194_v30 = vadd.f32 %v193_v22, %v192_v25  ;;  %v208_v42 = vmul.f32 %v525_v33, %v207_v37 }
  0x1b   : > { %v196_v32 = vadd.f32 %v195_v27, %v194_v30  ;;  %v209_v44 = vadd.f32 %v525_v33, %v208_v42 }
  0x1d   : > { %v198_v34 = vadd.f32 %v197_v31, %v196_v32  ;;  %v211_v48 = vsel %vm210_vm1, %v525_v33, %v209_v44 }
  0x1e   : > { %337 = vperm.xlu2 %523, %v483_v26  }
  0x1f   : > { %324 = vperm.xlu1 %522, %v269_v28   ;;  %319 = vperm.xlu0 %521, %v268_v29   ;;  %v199_v36 = vrot.slane %v198_v34, 4 }
  0x21   : > { %v200_v41 = vadd.f32 %v199_v36, %v198_v34 }
  0x23   : > { %v201_v43 = vrot.slane %v200_v41, 2 }
  0x25   : > { %v202_v45 = vadd.f32 %v201_v43, %v200_v41 }
  0x26   : > { %352 = vperm.xlu2 %523, %v486_v38  }
  0x27   : > { %347 = vperm.xlu1 %522, %v485_v39   ;;  %342 = vperm.xlu0 %521, %v484_v40   ;;  %v203_v46 = vrot.slane %v202_v45, 1 }
  0x29   : > { %v204_v51 = vadd.f32 %v203_v46, %v202_v45 }
  0x2b   : > { %v212_v52 = vmul.f32 %v211_v48, %v204_v51 }
  0x2d   : > { %v213_v53 = vsub.f32 %v604_v4, %v212_v52  ;;  %v659_v54 = vsub.f32 %v606_v5, %v212_v52  ;;  %v662_v55 = vsub.f32 %v608_v6, %v212_v52  ;;  %v216_v56 = vsub.f32 %v178_v8, %v212_v52 }
  0x2e   : > { %367 = vperm.xlu2 %523, %v489_v47   ;;  %v664_v57 = vsub.f32 %v179_v14, %v212_v52  ;;  %v670_v62 = vsub.f32 %v180_v17, %v212_v52  ;;  %v219_v4 = vsub.f32 %v181_v20, %v212_v52  ;;  %v683_v8 = vsub.f32 %v182_v24, %v212_v52 }
  0x2f   : > { %362 = vperm.xlu1 %522, %v488_v49   ;;  %357 = vperm.xlu0 %521, %v487_v50   ;;  %v221_v58 = vmul.f32 %v213_v53, %v213_v53  ;;  %v222_v59 = vmul.f32 %v659_v54, %v659_v54  ;;  %v223_v60 = vmul.f32 %v662_v55, %v662_v55 }
  0x30   : > { %v224_v61 = vmul.f32 %v216_v56, %v216_v56  ;;  %v225_v0 = vmul.f32 %v664_v57, %v664_v57  ;;  %v226_v6 = vmul.f32 %v670_v62, %v670_v62  ;;  %v227_v10 = vmul.f32 %v219_v4, %v219_v4 }
  0x31   : > { %v229_v1 = vsel %vm183_vm0, %v221_v58, 0.0  ;;  %v230_v2 = vsel %vm183_vm0, %v222_v59, 0.0  ;;  %v232_v3 = vsel %vm183_vm0, %v223_v60, 0.0  ;;  %v228_v13 = vmul.f32 %v683_v8, %v683_v8 }
  0x32   : > { %v231_v5 = vadd.f32 %v230_v2, %v229_v1  ;;  %v234_v7 = vsel %vm183_vm0, %v224_v61, 0.0  ;;  %v236_v11 = vsel %vm183_vm0, %v225_v0, 0.0  ;;  %v238_v14 = vsel %vm183_vm0, %v226_v6, 0.0 }
  0x33   : > { %v240_v16 = vsel %vm183_vm0, %v227_v10, 0.0  ;;  %v242_v18 = vsel %vm183_vm0, %v228_v13, 0.0 }
  0x34   : > { %v233_v9 = vadd.f32 %v232_v3, %v231_v5 }
  0x36   : > { %v235_v12 = vadd.f32 %v234_v7, %v233_v9 }
  0x37   : > { %372 = vperm.xlu0 %521, %v490_v63  }
  0x38   : > { %v237_v15 = vadd.f32 %v236_v11, %v235_v12 }
  0x3a   : > { %v239_v17 = vadd.f32 %v238_v14, %v237_v15 }
  0x3c   : > { %v241_v19 = vadd.f32 %v240_v16, %v239_v17 }
  0x3e   : > { %v243_v20 = vadd.f32 %v242_v18, %v241_v19 }
  0x40   : > { %v244_v21 = vrot.slane %v243_v20, 4 }
  0x42   : > { %v245_v22 = vadd.f32 %v244_v21, %v243_v20 }
  0x44   : > { %v246_v23 = vrot.slane %v245_v22, 2 }
  0x46   : > { %v247_v24 = vadd.f32 %v246_v23, %v245_v22 }
  0x48   : > { %v248_v25 = vrot.slane %v247_v24, 1 }
  0x4a   : > { %v249_v26 = vadd.f32 %v248_v25, %v247_v24 }
  0x4c   : > { %v250_v27 = vmul.f32 0.015873017, %v249_v26 }
  0x4e   : > { %v251_v28 = vadd.f32 1e-05, %v250_v27 }
  0x50   : > { %526 = vrsqrt.f32 %v251_v28  ;;  %vm258_vm2 = vweird.f32 %v251_v28 }
  0x56   : > { %v527_v29 = vpop.eup %526 }
  0x57   : > { %v253_v30 = vmul.f32 %v527_v29, %v251_v28  ;;  %vm259_vm3 = vweird.f32 %v527_v29 }
  0x58   : > { %vm260_vm4 = vmor %vm258_vm2, %vm259_vm3 }
  0x59   : > { %v254_v32 = vmul.f32 %v527_v29, %v253_v30 }
  0x5b   : > { %v255_v33 = vmul.f32 0.5, %v254_v32 }
  0x5d   : > { %v256_v34 = vsub.f32 1.5, %v255_v33 }
  0x5f   : > { %v257_v36 = vmul.f32 %v527_v29, %v256_v34 }
  0x61   : > { %v261_v37 = vsel %vm260_vm4, %v527_v29, %v257_v36 }
  0x62   : > { %v279_v39 = vmul.f32 %v261_v37, %v213_v53  ;;  %v282_v44 = vmul.f32 %v261_v37, %v216_v56  ;;  %v285_v50 = vmul.f32 %v261_v37, %v219_v4  ;;  %v281_v59 = vmul.f32 %v261_v37, %v662_v55 }
  0x63   : > { %v280_v60 = vmul.f32 %v261_v37, %v659_v54  ;;  %v283_v4 = vmul.f32 %v261_v37, %v664_v57  ;;  %v284_v5 = vmul.f32 %v261_v37, %v670_v62  ;;  %v286_v11 = vmul.f32 %v261_v37, %v683_v8 }
  0x68   : > { %v310_v31 = vpop.permute.xlu2 %309 }
  0x69   : > { %v331_v54 = vmul.f32 %v310_v31, %v283_v4 }
  0x70   : > { %v315_v35 = vpop.permute.xlu2 %314 }
  0x71   : > { %v332_v55 = vmul.f32 %v315_v35, %v284_v5 }
  0x78   : > { %v338_v38 = vpop.permute.xlu2 %337 }
  0x80   : > { %v353_v45 = vpop.permute.xlu2 %352 }
  0x81   : > { %v300_v40 = vpop.permute.xlu1 %299  ;;  %v290_v41 = vpop.permute.xlu0 %289 }
  0x82   : > { %v327_v42 = vmul.f32 %v290_v41, %v279_v39  ;;  %v329_v56 = vmul.f32 %v300_v40, %v281_v59 }
  0x84   : > { %v375_v43 = vadd.f32 %v338_v38, %v327_v42 }
  0x86   : > { %383 = vst.msk [vmem:[%s696_s28] sm:$0xff] %vm183_vm0, %v375_v43 }
  0x88   : > { %v368_v58 = vpop.permute.xlu2 %367 }
  0x89   : > { %v305_v46 = vpop.permute.xlu1 %304  ;;  %v295_v47 = vpop.permute.xlu0 %294 }
  0x8a   : > { %v330_v48 = vmul.f32 %v305_v46, %v282_v44  ;;  %v328_v63 = vmul.f32 %v295_v47, %v280_v60 }
  0x8c   : > { %v378_v49 = vadd.f32 %v353_v45, %v330_v48 }
  0x8e   : > { %386 = vst.msk [vmem:[%s696_s28 + $0x18] sm:$0xff] %vm183_vm0, %v378_v49 }
  0x91   : > { %v325_v51 = vpop.permute.xlu1 %324  ;;  %v320_v52 = vpop.permute.xlu0 %319 }
  0x92   : > { %v333_v53 = vmul.f32 %v320_v52, %v285_v50  ;;  %v334_v57 = vmul.f32 %v325_v51, %v286_v11 }
  0x94   : > { %v381_v61 = vadd.f32 %v368_v58, %v333_v53 }
  0x96   : > { %389 = vst.msk [vmem:[%s696_s28 + $0x30] sm:$0xff] %vm183_vm0, %v381_v61 }
  0x99   : > { %v348_v0 = vpop.permute.xlu1 %347  ;;  %v343_v1 = vpop.permute.xlu0 %342 }
  0x9a   : > { %v377_v2 = vadd.f32 %v348_v0, %v329_v56  ;;  %v376_v3 = vadd.f32 %v343_v1, %v328_v63 }
  0x9c   : > { %385 = vst.msk [vmem:[%s696_s28 + $0x10] sm:$0xff] %vm183_vm0, %v377_v2 }
  0x9d   : > { %384 = vst.msk [vmem:[%s696_s28 + $0x8] sm:$0xff] %vm183_vm0, %v376_v3 }
  0xa1   : > { %v363_v6 = vpop.permute.xlu1 %362  ;;  %v358_v7 = vpop.permute.xlu0 %357 }
  0xa2   : > { %v380_v9 = vadd.f32 %v363_v6, %v332_v55  ;;  %v379_v10 = vadd.f32 %v358_v7, %v331_v54 }
  0xa4   : > { %388 = vst.msk [vmem:[%s696_s28 + $0x28] sm:$0xff] %vm183_vm0, %v380_v9 }
  0xa5   : > { %387 = vst.msk [vmem:[%s696_s28 + $0x20] sm:$0xff] %vm183_vm0, %v379_v10 }
  0xa9   : > { %v373_v12 = vpop.permute.xlu0 %372 }
  0xaa   : > { %v382_v13 = vadd.f32 %v373_v12, %v334_v57 }
  0xac   : > { %390 = vst.msk [vmem:[%s696_s28 + $0x38] sm:$0xff] %vm183_vm0, %v382_v13 }
  0xad PF: > { %s12_s11 = sadd.s32 1, %s550_s11   ;;  %s731_s9 = smov %s546_s10 }
  0xae   : > { %p9_p5 = scmp.ge.s32.totalorder %s12_s11, 4   ;;  %s732_s10 = smov %s734_s12 }
  0xb0   :  { %11 = sbr.rel (!%p9_p5) target bundleno = 2 (0x2), region = 59 }

</bundles_post_ra>
